<compile_context>
chip_gen: v5e
topology: v5e:2x2
jax: 0.10.0
libtpu: 0.0.40
codegen_flags: <defaults>
</compile_context>

<pallas_src>
import jax
import jax.numpy as jnp
from jax import lax
from jax.experimental import pallas as pl
from jax.experimental.pallas import tpu as pltpu

LN_EPS = 1e-5


def _cdiv(a, b):
    return -(-a // b)


# ----------------------------- Pallas kernel ---------------------------------


def _make_kernel(th, wo, ssc, ndx, e):
    tm = th * wo

    def kernel(xs_ref, w_ref, aff_ref, o_ref, acc_ref):
        # xs_ref : (Hq, Wq, s*s*C) bf16   whole space-to-depth image of batch b
        # w_ref  : (ndx*ndx, s*s*C, E) bf16 grouped conv weight (zeros for taps
        #                                   outside the k x k window)
        # aff_ref: (3, E) f32             rows = conv bias, LN gamma, LN beta
        # o_ref  : (Th, Wo, E)            output tile
        # acc_ref: (Th*Wo, E) f32         accumulator scratch
        r0 = pl.program_id(1) * th
        for g in range(ndx * ndx):                       # unrolled: ceil(k/s)^2 taps groups
            dy, dx = g // ndx, g % ndx
            tap = xs_ref[pl.ds(r0 + dy, th), pl.ds(dx, wo), :]       # (Th, Wo, s*s*C)
            contrib = jnp.dot(tap.reshape(tm, ssc), w_ref[g],
                              preferred_element_type=jnp.float32)
            if g == 0:
                acc_ref[...] = contrib
            else:
                acc_ref[...] += contrib

        y = acc_ref[...] + aff_ref[0:1, :]               # conv bias
        # LayerNorm over embed_dim (f32 stats, centered two-pass variance).
        mean = jnp.mean(y, axis=-1, keepdims=True)
        yc = y - mean
        var = jnp.mean(yc * yc, axis=-1, keepdims=True)
        inv = lax.rsqrt(var + LN_EPS)
        out = yc * inv * aff_ref[1:2, :] + aff_ref[2:3, :]
        o_ref[...] = out.astype(o_ref.dtype).reshape(th, wo, e)

    return kernel


# ------------------------------- wrapper --------------------------------------


def overlap_patch_embed_forward(x_nchw, params, *, patch_size, stride,
                                out_dtype=jnp.float32):
    k, s = patch_size, stride
    pad = k // 2
    B, C, H, W = x_nchw.shape
    E = params['proj_w'].shape[0]

    Ho = (H + 2 * pad - k) // s + 1
    Wo = (W + 2 * pad - k) // s + 1
    ndx = _cdiv(k, s)                         # conv taps grouped by stride phase

    # Row tile: ~1024 tokens per grid step, >= 2 total grid steps when possible
    # (v7x has 2 TensorCores), minimal Ho padding.
    th = max(1, min(Ho, 1024 // max(Wo, 1)))
    if B * _cdiv(Ho, th) < 2 and Ho >= 2:
        th = _cdiv(Ho, 2)
    n_tiles = _cdiv(Ho, th)
    th = _cdiv(Ho, n_tiles)
    Ho_pad = n_tiles * th

    Hq = Ho_pad + ndx - 1                     # row/col blocks the kernel may touch
    Wq = Wo + ndx - 1
    ssc = s * s * C

    # --- layout plumbing only (bf16, ~1x input traffic):
    # NCHW -> NHWC -> pad/crop to exactly (Hq*s, Wq*s) -> space-to-depth.
    xh = jnp.transpose(x_nchw.astype(jnp.bfloat16), (0, 2, 3, 1))
    xh = jnp.pad(xh, ((0, 0),
                      (pad, max(0, Hq * s - pad - H)),
                      (pad, max(0, Wq * s - pad - W)),
                      (0, 0)))[:, :Hq * s, :Wq * s, :]
    xs = xh.reshape(B, Hq, s, Wq, s, C)
    xs = jnp.transpose(xs, (0, 1, 3, 2, 4, 5)).reshape(B, Hq, Wq, ssc)

    # --- torch conv weight (E, C, k, k) -> grouped (ndx*ndx, s*s*C, E); taps
    # with ky or kx >= k get zero weight (their lanes are read but contribute 0).
    wt = jnp.transpose(params['proj_w'], (2, 3, 1, 0))               # (k, k, C, E)
    wt = jnp.pad(wt, ((0, ndx * s - k), (0, ndx * s - k), (0, 0), (0, 0)))
    wt = wt.reshape(ndx, s, ndx, s, C, E).transpose(0, 2, 1, 3, 4, 5)
    wg = wt.reshape(ndx * ndx, ssc, E).astype(jnp.bfloat16)

    aff = jnp.stack([params['proj_b'], params['ln_g'], params['ln_b']]
                    ).astype(jnp.float32)                            # (3, E)

    kernel = _make_kernel(th, Wo, ssc, ndx, E)
    out = pl.pallas_call(
        kernel,
        out_shape=jax.ShapeDtypeStruct((B, Ho_pad, Wo, E), out_dtype),
        grid_spec=pltpu.PrefetchScalarGridSpec(
            num_scalar_prefetch=0,
            grid=(B, n_tiles),
            in_specs=[
                # Whole image per batch element; block index constant across
                # the row-tile axis -> DMA'd once per image.
                pl.BlockSpec((None, Hq, Wq, ssc), lambda b, i: (b, 0, 0, 0)),
                pl.BlockSpec((ndx * ndx, ssc, E), lambda b, i: (0, 0, 0)),
                pl.BlockSpec((3, E), lambda b, i: (0, 0)),
            ],
            out_specs=pl.BlockSpec((None, th, Wo, E), lambda b, i: (b, i, 0, 0)),
            scratch_shapes=[pltpu.VMEM((th * Wo, E), jnp.float32)],
        ),
        compiler_params=pltpu.CompilerParams(
            dimension_semantics=("parallel", "parallel")),
    )(xs, wg, aff)

    # Padded output rows (if any) hold finite garbage (zero inputs -> LN beta)
    # and are sliced off here.
    tokens = out[:, :Ho].reshape(B, Ho * Wo, E)
    return tokens, Ho, Wo


# ----------------------- parameter init & pure-JAX reference ------------------


def init_params(key, in_chans, embed_dim, patch_size):
    kconv, kg, kb = jax.random.split(key, 3)
    fan_out = patch_size * patch_size * embed_dim        # conv2d init: N(0, sqrt(2/fan_out))
    std = (2.0 / fan_out) ** 0.5
    return {
        'proj_w': std * jax.random.normal(
            kconv, (embed_dim, in_chans, patch_size, patch_size), jnp.float32),
        'proj_b': jnp.zeros((embed_dim,), jnp.float32),
        # nn.LayerNorm inits gamma=1, beta=0; perturb slightly so the affine
        # path of the kernel is actually exercised by the correctness check.
        'ln_g': 1.0 + 0.1 * jax.random.normal(kg, (embed_dim,), jnp.float32),
        'ln_b': 0.1 * jax.random.normal(kb, (embed_dim,), jnp.float32),
    }


def overlap_patch_embed_reference(x, params, *, patch_size, stride):
    pad = patch_size // 2
    y = lax.conv_general_dilated(
        x, params['proj_w'], (stride, stride), ((pad, pad), (pad, pad)),
        dimension_numbers=('NCHW', 'OIHW', 'NCHW'))
    y = y + params['proj_b'][None, :, None, None]
    B, E, Ho, Wo = y.shape
    tok = jnp.transpose(y.reshape(B, E, Ho * Wo), (0, 2, 1))        # (B, L, E)
    mean = tok.mean(-1, keepdims=True)
    var = tok.var(-1, keepdims=True)                                # biased, like torch LN
    out = (tok - mean) / jnp.sqrt(var + LN_EPS) * params['ln_g'] + params['ln_b']
    return out, Ho, Wo


if __name__ == "__main__":
    B, in_chans, H, W = 2, 8, 16, 16
    patch_size, stride, embed_dim = 7, 4, 128

    root = jax.random.PRNGKey(0)
    kx, kp = jax.random.split(root)
    x = jax.random.normal(kx, (B, in_chans, H, W), jnp.float32)     # NCHW like PyTorch
    params = init_params(kp, in_chans, embed_dim, patch_size)

    tokens, Ho, Wo = overlap_patch_embed_forward(
        x, params, patch_size=patch_size, stride=stride)
    tokens = jax.block_until_ready(tokens)

    ref, Ho_r, Wo_r = overlap_patch_embed_reference(
        x, params, patch_size=patch_size, stride=stride)
    assert (Ho, Wo) == (Ho_r, Wo_r), (Ho, Wo, Ho_r, Wo_r)
    assert tokens.shape == (B, Ho * Wo, embed_dim), tokens.shape
    max_err = float(jnp.max(jnp.abs(tokens - ref)))
    # bf16 matmul inputs -> bf16-level tolerance; stats/accumulation are f32.
    assert jnp.allclose(tokens, ref, atol=3e-2, rtol=3e-2), max_err

    print("KERNEL_OK")
</pallas_src>

<mosaic_0001>
module attributes {stable_mosaic.version = 11 : i64} {
  func.func @kernel(%arg0: i32, %arg1: i32, %arg2: memref<1x5x5x128xbf16, #tpu.memory_space<vmem>>, %arg3: memref<4x128x128xbf16, #tpu.memory_space<vmem>>, %arg4: memref<3x128xf32, #tpu.memory_space<vmem>>, %arg5: memref<1x4x4x128xf32, #tpu.memory_space<vmem>>, %arg6: memref<16x128xf32, #tpu.memory_space<vmem>>) attributes {dimension_semantics = [#tpu.dimension_semantics<parallel>, #tpu.dimension_semantics<parallel>], iteration_bounds = array<i64: 2, 1>, scalar_prefetch = 0 : i64, scratch_operands = 1 : i64, tpu.core_type = #tpu.core_type<tc>, window_params = [{transform_indices = @transform_0, window_bounds = array<i64: 1, 5, 5, 128>}, {pipeline_mode = #tpu.pipeline_mode<synchronous>, transform_indices = @transform_1, window_bounds = array<i64: 4, 128, 128>}, {pipeline_mode = #tpu.pipeline_mode<synchronous>, transform_indices = @transform_2, window_bounds = array<i64: 3, 128>}, {transform_indices = @transform_3, window_bounds = array<i64: 1, 4, 4, 128>}]} {
    %c4_i32 = arith.constant 4 : i32
    %0 = arith.muli %arg1, %c4_i32 : i32
    %c0_i32 = arith.constant 0 : i32
    %1 = arith.addi %0, %c0_i32 : i32
    %c0 = arith.constant 0 : index
    %2 = arith.index_cast %1 : i32 to index
    %c0_0 = arith.constant 0 : index
    %c0_1 = arith.constant 0 : index
    %3 = vector.load %arg2[%c0, %2, %c0_0, %c0_1] : memref<1x5x5x128xbf16, #tpu.memory_space<vmem>>, vector<1x4x4x128xbf16>
    %4 = vector.shape_cast %3 : vector<1x4x4x128xbf16> to vector<4x4x128xbf16>
    %5 = vector.shape_cast %4 : vector<4x4x128xbf16> to vector<16x128xbf16>
    %c0_2 = arith.constant 0 : index
    %c0_3 = arith.constant 0 : index
    %c0_4 = arith.constant 0 : index
    %6 = vector.load %arg3[%c0_2, %c0_3, %c0_4] : memref<4x128x128xbf16, #tpu.memory_space<vmem>>, vector<1x128x128xbf16>
    %7 = vector.shape_cast %6 : vector<1x128x128xbf16> to vector<128x128xbf16>
    %cst = arith.constant dense<0.000000e+00> : vector<16x128xf32>
    %8 = tpu.matmul %5, %7, %cst {dimension_numbers = #tpu.dot_dimension_numbers<[1], [0], [0], [1], [0, 0, 1, 1], [], []>} : vector<16x128xbf16>, vector<128x128xbf16>, vector<16x128xf32> -> vector<16x128xf32>
    %c0_5 = arith.constant 0 : index
    %c0_6 = arith.constant 0 : index
    %9 = vector.load %arg6[%c0_5, %c0_6] : memref<16x128xf32, #tpu.memory_space<vmem>>, vector<16x128xf32>
    tpu.vector_store %arg6[%c0_5, %c0_6], %8 {strides = array<i32>} : memref<16x128xf32, #tpu.memory_space<vmem>>, vector<16x128xf32>,
    %c0_i32_7 = arith.constant 0 : i32
    %10 = arith.addi %0, %c0_i32_7 : i32
    %c0_8 = arith.constant 0 : index
    %11 = arith.index_cast %10 : i32 to index
    %c1 = arith.constant 1 : index
    %c0_9 = arith.constant 0 : index
    %12 = vector.load %arg2[%c0_8, %11, %c1, %c0_9] : memref<1x5x5x128xbf16, #tpu.memory_space<vmem>>, vector<1x4x4x128xbf16>
    %13 = vector.shape_cast %12 : vector<1x4x4x128xbf16> to vector<4x4x128xbf16>
    %14 = vector.shape_cast %13 : vector<4x4x128xbf16> to vector<16x128xbf16>
    %c1_10 = arith.constant 1 : index
    %c0_11 = arith.constant 0 : index
    %c0_12 = arith.constant 0 : index
    %15 = vector.load %arg3[%c1_10, %c0_11, %c0_12] : memref<4x128x128xbf16, #tpu.memory_space<vmem>>, vector<1x128x128xbf16>
    %16 = vector.shape_cast %15 : vector<1x128x128xbf16> to vector<128x128xbf16>
    %cst_13 = arith.constant dense<0.000000e+00> : vector<16x128xf32>
    %17 = tpu.matmul %14, %16, %cst_13 {dimension_numbers = #tpu.dot_dimension_numbers<[1], [0], [0], [1], [0, 0, 1, 1], [], []>} : vector<16x128xbf16>, vector<128x128xbf16>, vector<16x128xf32> -> vector<16x128xf32>
    %c0_14 = arith.constant 0 : index
    %c0_15 = arith.constant 0 : index
    %18 = vector.load %arg6[%c0_14, %c0_15] : memref<16x128xf32, #tpu.memory_space<vmem>>, vector<16x128xf32>
    %19 = arith.addf %18, %17 : vector<16x128xf32>
    %c0_16 = arith.constant 0 : index
    %c0_17 = arith.constant 0 : index
    %20 = vector.load %arg6[%c0_16, %c0_17] : memref<16x128xf32, #tpu.memory_space<vmem>>, vector<16x128xf32>
    tpu.vector_store %arg6[%c0_16, %c0_17], %19 {strides = array<i32>} : memref<16x128xf32, #tpu.memory_space<vmem>>, vector<16x128xf32>,
    %c1_i32 = arith.constant 1 : i32
    %21 = arith.addi %0, %c1_i32 : i32
    %c0_18 = arith.constant 0 : index
    %22 = arith.index_cast %21 : i32 to index
    %c0_19 = arith.constant 0 : index
    %c0_20 = arith.constant 0 : index
    %23 = vector.load %arg2[%c0_18, %22, %c0_19, %c0_20] : memref<1x5x5x128xbf16, #tpu.memory_space<vmem>>, vector<1x4x4x128xbf16>
    %24 = vector.shape_cast %23 : vector<1x4x4x128xbf16> to vector<4x4x128xbf16>
    %25 = vector.shape_cast %24 : vector<4x4x128xbf16> to vector<16x128xbf16>
    %c2 = arith.constant 2 : index
    %c0_21 = arith.constant 0 : index
    %c0_22 = arith.constant 0 : index
    %26 = vector.load %arg3[%c2, %c0_21, %c0_22] : memref<4x128x128xbf16, #tpu.memory_space<vmem>>, vector<1x128x128xbf16>
    %27 = vector.shape_cast %26 : vector<1x128x128xbf16> to vector<128x128xbf16>
    %cst_23 = arith.constant dense<0.000000e+00> : vector<16x128xf32>
    %28 = tpu.matmul %25, %27, %cst_23 {dimension_numbers = #tpu.dot_dimension_numbers<[1], [0], [0], [1], [0, 0, 1, 1], [], []>} : vector<16x128xbf16>, vector<128x128xbf16>, vector<16x128xf32> -> vector<16x128xf32>
    %c0_24 = arith.constant 0 : index
    %c0_25 = arith.constant 0 : index
    %29 = vector.load %arg6[%c0_24, %c0_25] : memref<16x128xf32, #tpu.memory_space<vmem>>, vector<16x128xf32>
    %30 = arith.addf %29, %28 : vector<16x128xf32>
    %c0_26 = arith.constant 0 : index
    %c0_27 = arith.constant 0 : index
    %31 = vector.load %arg6[%c0_26, %c0_27] : memref<16x128xf32, #tpu.memory_space<vmem>>, vector<16x128xf32>
    tpu.vector_store %arg6[%c0_26, %c0_27], %30 {strides = array<i32>} : memref<16x128xf32, #tpu.memory_space<vmem>>, vector<16x128xf32>,
    %c1_i32_28 = arith.constant 1 : i32
    %32 = arith.addi %0, %c1_i32_28 : i32
    %c0_29 = arith.constant 0 : index
    %33 = arith.index_cast %32 : i32 to index
    %c1_30 = arith.constant 1 : index
    %c0_31 = arith.constant 0 : index
    %34 = vector.load %arg2[%c0_29, %33, %c1_30, %c0_31] : memref<1x5x5x128xbf16, #tpu.memory_space<vmem>>, vector<1x4x4x128xbf16>
    %35 = vector.shape_cast %34 : vector<1x4x4x128xbf16> to vector<4x4x128xbf16>
    %36 = vector.shape_cast %35 : vector<4x4x128xbf16> to vector<16x128xbf16>
    %c3 = arith.constant 3 : index
    %c0_32 = arith.constant 0 : index
    %c0_33 = arith.constant 0 : index
    %37 = vector.load %arg3[%c3, %c0_32, %c0_33] : memref<4x128x128xbf16, #tpu.memory_space<vmem>>, vector<1x128x128xbf16>
    %38 = vector.shape_cast %37 : vector<1x128x128xbf16> to vector<128x128xbf16>
    %cst_34 = arith.constant dense<0.000000e+00> : vector<16x128xf32>
    %39 = tpu.matmul %36, %38, %cst_34 {dimension_numbers = #tpu.dot_dimension_numbers<[1], [0], [0], [1], [0, 0, 1, 1], [], []>} : vector<16x128xbf16>, vector<128x128xbf16>, vector<16x128xf32> -> vector<16x128xf32>
    %c0_35 = arith.constant 0 : index
    %c0_36 = arith.constant 0 : index
    %40 = vector.load %arg6[%c0_35, %c0_36] : memref<16x128xf32, #tpu.memory_space<vmem>>, vector<16x128xf32>
    %41 = arith.addf %40, %39 : vector<16x128xf32>
    %c0_37 = arith.constant 0 : index
    %c0_38 = arith.constant 0 : index
    %42 = vector.load %arg6[%c0_37, %c0_38] : memref<16x128xf32, #tpu.memory_space<vmem>>, vector<16x128xf32>
    tpu.vector_store %arg6[%c0_37, %c0_38], %41 {strides = array<i32>} : memref<16x128xf32, #tpu.memory_space<vmem>>, vector<16x128xf32>,
    %c0_39 = arith.constant 0 : index
    %c0_40 = arith.constant 0 : index
    %43 = vector.load %arg6[%c0_39, %c0_40] : memref<16x128xf32, #tpu.memory_space<vmem>>, vector<16x128xf32>
    %c0_41 = arith.constant 0 : index
    %c0_42 = arith.constant 0 : index
    %44 = vector.load %arg4[%c0_41, %c0_42] : memref<3x128xf32, #tpu.memory_space<vmem>>, vector<1x128xf32>
    %45 = vector.broadcast %44 : vector<1x128xf32> to vector<16x128xf32>
    %46 = arith.addf %43, %45 : vector<16x128xf32>
    %cst_43 = arith.constant dense<0.000000e+00> : vector<16xf32>
    %47 = vector.multi_reduction <add>, %46, %cst_43 [1] : vector<16x128xf32> to vector<16xf32>
    %48 = vector.shape_cast %47 : vector<16xf32> to vector<16x1xf32>
    %cst_44 = arith.constant 1.280000e+02 : f32
    %49 = vector.broadcast %cst_44 : f32 to vector<16x1xf32>
    %50 = arith.divf %48, %49 : vector<16x1xf32>
    %51 = vector.broadcast %50 : vector<16x1xf32> to vector<16x128xf32>
    %52 = arith.subf %46, %51 : vector<16x128xf32>
    %53 = arith.mulf %52, %52 : vector<16x128xf32>
    %cst_45 = arith.constant dense<0.000000e+00> : vector<16xf32>
    %54 = vector.multi_reduction <add>, %53, %cst_45 [1] : vector<16x128xf32> to vector<16xf32>
    %55 = vector.shape_cast %54 : vector<16xf32> to vector<16x1xf32>
    %cst_46 = arith.constant 1.280000e+02 : f32
    %56 = vector.broadcast %cst_46 : f32 to vector<16x1xf32>
    %57 = arith.divf %55, %56 : vector<16x1xf32>
    %cst_47 = arith.constant 9.99999974E-6 : f32
    %58 = vector.broadcast %cst_47 : f32 to vector<16x1xf32>
    %59 = arith.addf %57, %58 : vector<16x1xf32>
    %60 = math.rsqrt %59 : vector<16x1xf32>
    %61 = vector.broadcast %60 : vector<16x1xf32> to vector<16x128xf32>
    %62 = arith.mulf %52, %61 : vector<16x128xf32>
    %c1_48 = arith.constant 1 : index
    %c0_49 = arith.constant 0 : index
    %63 = vector.load %arg4[%c1_48, %c0_49] : memref<3x128xf32, #tpu.memory_space<vmem>>, vector<1x128xf32>
    %64 = vector.broadcast %63 : vector<1x128xf32> to vector<16x128xf32>
    %65 = arith.mulf %62, %64 : vector<16x128xf32>
    %c2_50 = arith.constant 2 : index
    %c0_51 = arith.constant 0 : index
    %66 = vector.load %arg4[%c2_50, %c0_51] : memref<3x128xf32, #tpu.memory_space<vmem>>, vector<1x128xf32>
    %67 = vector.broadcast %66 : vector<1x128xf32> to vector<16x128xf32>
    %68 = arith.addf %65, %67 : vector<16x128xf32>
    %69 = vector.shape_cast %68 : vector<16x128xf32> to vector<4x4x128xf32>
    %c0_52 = arith.constant 0 : index
    %c0_53 = arith.constant 0 : index
    %c0_54 = arith.constant 0 : index
    %c0_55 = arith.constant 0 : index
    %70 = vector.load %arg5[%c0_52, %c0_53, %c0_54, %c0_55] : memref<1x4x4x128xf32, #tpu.memory_space<vmem>>, vector<1x4x4x128xf32>
    %71 = vector.shape_cast %70 : vector<1x4x4x128xf32> to vector<4x4x128xf32>
    %72 = vector.shape_cast %69 : vector<4x4x128xf32> to vector<1x4x4x128xf32>
    tpu.vector_store %arg5[%c0_52, %c0_53, %c0_54, %c0_55], %72 {strides = array<i32>} : memref<1x4x4x128xf32, #tpu.memory_space<vmem>>, vector<1x4x4x128xf32>,
    return
  }
  func.func @transform_0(%arg0: i32, %arg1: i32) -> (i32, i32, i32, i32) {
    %c0_i32 = arith.constant 0 : i32
    %c0_i32_0 = arith.constant 0 : i32
    %c0_i32_1 = arith.constant 0 : i32
    %c0_i32_2 = arith.constant 0 : i32
    return %arg0, %c0_i32, %c0_i32_0, %c0_i32_1 : i32, i32, i32, i32
  }
  func.func @transform_1(%arg0: i32, %arg1: i32) -> (i32, i32, i32) {
    %c0_i32 = arith.constant 0 : i32
    %c0_i32_0 = arith.constant 0 : i32
    %c0_i32_1 = arith.constant 0 : i32
    %c0_i32_2 = arith.constant 0 : i32
    return %c0_i32, %c0_i32_0, %c0_i32_1 : i32, i32, i32
  }
  func.func @transform_2(%arg0: i32, %arg1: i32) -> (i32, i32) {
    %c0_i32 = arith.constant 0 : i32
    %c0_i32_0 = arith.constant 0 : i32
    %c0_i32_1 = arith.constant 0 : i32
    return %c0_i32, %c0_i32_0 : i32, i32
  }
  func.func @transform_3(%arg0: i32, %arg1: i32) -> (i32, i32, i32, i32) {
    %c0_i32 = arith.constant 0 : i32
    %c0_i32_0 = arith.constant 0 : i32
    %c0_i32_1 = arith.constant 0 : i32
    return %arg0, %arg1, %c0_i32, %c0_i32_0 : i32, i32, i32, i32
  }
}

</mosaic_0001>

<bundles_post_ra>
// kernel: tpu_custom_call.1
= control target key start
LH: loop header
LB: loop body
LE: loop exit
PB: predicated region body
PF: predicated region fallthrough
CT: control target
= control target key end

     0   :  { %8 = vsyncpa [#allocation4], 0  ;;  %s1554_s0 = inlined_call_operand.vmem [shape: bf16[2,5,5,128], index: 0, kind: input, shape index: {}]   ;;  %s1555_s1 = inlined_call_operand.hbm [shape: bf16[4,128,128], index: 1, kind: input, shape index: {}]   ;;  %s1556_s2 = inlined_call_operand.vmem [shape: f32[3,128], index: 2, kind: input, shape index: {}]   ;;  %s1557_s3 = inlined_call_operand.hbm [shape: f32[2,4,4,128], index: 3, kind: output, shape index: {}]  }
   0x1   :  { %9 = vsyncpa [#allocation5], 0 }
   0x2   :  { %11 = vsyncpa [#allocation5 + $0x1], 0  ;;  %s1371_s12 = smov 0   ;;  %s1373_s13 = smov 0  }
   0x3   :  { %s1375_s14 = smov 0   ;;  %s1377_s15 = smov 0  }
   0x4   :  { %s1379_s16 = smov 0   ;;  %s1381_s17 = smov 0  }
   0x5 LB: > { %s967_s18 = sadd.s32 4294967295, %s1343_s17   ;;  %s968_s19 = sadd.s32 4294967294, %s1343_s17   ;;  %s1343_s17 = sphi %s1381_s17, %s17_s17   ;;  %s1339_s16 = sphi %s1379_s16, %s1570_s16   ;;  %s1335_s15 = sphi %s1377_s15, %s1569_s15   ;;  %s1331_s14 = sphi %s1375_s14, %s1568_s14   ;;  %s1327_s13 = sphi %s1373_s13, %s1567_s13   ;;  %s1323_s12 = sphi %s1371_s12, %s1566_s12  }
   0x6   : > { %s29_s20 = sadd.s32 1, %s1339_s16  ;;  %s106_s21 = sadd.s32 1, %s1331_s14 }
   0x7   : > { %p31_p0 = scmp.ge.s32.totalorder %s29_s20, 2  ;;  %p116_p1 = scmp.ne.s32.totalorder %s1331_s14, %s1327_s13 }
   0x8   : > { %p117_p2 = scmp.eq.s32.totalorder %s967_s18, 1  ;;  %p122_p3 = scmp.ne.s32.totalorder %s1327_s13, %s1323_s12 }
   0x9   : > { %s1572_s20 = smov (%p31_p0, %s29_s20), 0  ;;  %p123_p5 = scmp.eq.s32.totalorder %s968_s19, 1 }
   0xa   : > { %p1411_p4 = por %p117_p2, %p116_p1  ;;  %s101_s23 = ssub.s32 %s1339_s16, %s1572_s20 }
   0xb   : > { %p969_p6 = scmp.ge.s32.totalorder %s1343_s17, 1  ;;  %p104_p7 = scmp.eq.s32.totalorder %s101_s23, 0 }
   0xc   : > { %p1418_p8 = por %p123_p5, %p122_p3  ;;  %p130_p9 = scmp.lt.s32.totalorder %s1343_s17, 3 }
   0xd   : > { %s1424_s25 = scalar_select %p104_p7, %s1331_s14, %s106_s21  }
   0xe   : > { %p131_p10 = pnand %p969_p6, %p130_p9  ;;  %p1165_p11 = scmp.eq.s32.totalorder %s967_s18, 0 }
   0xf   : > { %s141_s28 = sshll.u32 %s1555_s1, 4  ;;  %s1345_s29 = smov [#allocation3]   ;;  %s142_s28 = int_to_ptr.hbm [resolvable:$true] %s141_s28 }
  0x10   : > { %p1157_p12 = pneg %p131_p10  ;;  %s143_s30 = sshll.u32 %s1345_s29, 4  ;;  %s144_s30 = int_to_ptr.vmem [resolvable:$true] %s143_s30 }
  0x11   : > { %s1346_s4 = smov 64   ;;  %s1347_s5 = smov 4  }
  0x12   : > { %p1158_p13 = pnand %p1165_p11, %p1157_p12  ;;  %170 = sbr.rel (%p131_p10) target bundleno = 499 (0x1f3), region = 32 }
  0x14   : > { %1160 = dma.hbm_to_vmem [thread:$0]  (!%p1158_p13), %s142_s28, 4096, %s144_s30, [#allocation4], %s1346_s4, %s1346_s4, %s1347_s5  }
  0x17   : > { %1314 = dma.done.wait (%p1165_p11), [#allocation4], 4096  }
  0x18   : > { %1316 = vsyncadd (%p1165_p11), [#allocation4], 4294963200  ;;  %p195_p0 = scmp.lt.s32.totalorder %s1335_s15, 1  ;;  %v1124_v0 = vld [vmem:[#allocation3 + $0x38] sm:$0xff]  ;;  %v1123_v4 = vld [vmem:[#allocation3 + $0x30] sm:$0xff]  ;;  %vm313_vm1 = vcmask 1041408  }
  0x19   : > { %v1132_v1 = vld [vmem:[#allocation3 + $0x78] sm:$0xff]  ;;  %285 = vmatpush.bf16.msra.mxu0 %v1124_v0  ;;  %v1131_v5 = vld [vmem:[#allocation3 + $0x70] sm:$0xff]  ;;  %v1122_v8 = vld [vmem:[#allocation3 + $0x28] sm:$0xff]  ;;  %vm339_vm0 = vsmask.f32 1280  ;;  %vm317_vm3 = vcmask 1043458  }
  0x1a   : > { %v1140_v2 = vld [vmem:[#allocation3 + $0xb8] sm:$0xff]  ;;  %s196_s6 = scalar_select %p195_p0, %s1335_s15, 1  ;;  %476 = vmatpush.bf16.msra.mxu1 %v1132_v1  ;;  %v1139_v6 = vld [vmem:[#allocation3 + $0xb0] sm:$0xff]  ;;  %v1130_v9 = vld [vmem:[#allocation3 + $0x68] sm:$0xff]  ;;  %vm340_vm2 = vsmask.f32 3336 }
  0x1b   : > { %v1148_v3 = vld [vmem:[#allocation3 + $0xf8] sm:$0xff]  ;;  %581 = vmatpush.bf16.msra.mxu2 %v1140_v2  ;;  %v1147_v7 = vld [vmem:[#allocation3 + $0xf0] sm:$0xff]  ;;  %v1138_v10 = vld [vmem:[#allocation3 + $0xa8] sm:$0xff]  ;;  %vm342_vm4 = vsmask.f32 5392  ;;  %s192_s19 = sand.u32 1, %s1327_s13  }
  0x1c   : > { %767 = vmatpush.bf16.msra.mxu3 %v1148_v3  ;;  %s1150_s7 = smul.u32 20, %s196_s6  ;;  %v1146_v11 = vld [vmem:[#allocation3 + $0xe8] sm:$0xff]  ;;  %v1121_v12 = vld [vmem:[#allocation3 + $0x20] sm:$0xff]  ;;  %v1120_v20 = vld [vmem:[#allocation3 + $0x18] sm:$0xff]  ;;  %vm344_vm5 = vsmask.f32 7448 }
  0x1d   : > { %286 = vmatpush.bf16.msra.mxu0 %v1123_v4  ;;  %v1129_v13 = vld [vmem:[#allocation3 + $0x60] sm:$0xff]  ;;  %v1128_v21 = vld [vmem:[#allocation3 + $0x58] sm:$0xff]  ;;  %v1119_v32 = vld [vmem:[#allocation3 + $0x10] sm:$0xff]  ;;  %s974_s26 = sshll.u32 %s192_s19, 4  ;;  %s1149_s29 = sshll.u32 %s1335_s15, 4 }
  0x1e   : > { %477 = vmatpush.bf16.msra.mxu1 %v1131_v5  ;;  %v1137_v14 = vld [vmem:[#allocation3 + $0xa0] sm:$0xff]  ;;  %s1434_s10 = scalar_lea.vmem %s1554_s0, %s1150_s7  ;;  %v1136_v30 = vld [vmem:[#allocation3 + $0x98] sm:$0xff]  ;;  %vm1450_vm6 = vmor %vm339_vm0, %vm340_vm2  ;;  %s194_s30 = scalar_lea.vmem [#allocation6], %s974_s26 }
  0x1f   : > { %582 = vmatpush.bf16.msra.mxu2 %v1139_v6  ;;  %v1145_v15 = vld [vmem:[#allocation3 + $0xe0] sm:$0xff]  ;;  %v204_v16 = vld [vmem:[%s1434_s10] sm:$0x3]  ;;  %v205_v17 = vld [vmem:[%s1434_s10 + $0x4] sm:$0x3]  ;;  %s872_s6 = scalar_lea.hbm %s1557_s3, %s1149_s29  ;;  %s873_s7 = sshll.u32 %s194_s30, 4  ;;  %s874_s7 = int_to_ptr.vmem [resolvable:$true] %s873_s7 }
  0x20   : > { %768 = vmatpush.bf16.msra.mxu3 %v1147_v7  ;;  %v206_v18 = vld [vmem:[%s1434_s10 + $0x8] sm:$0x3]  ;;  %v207_v19 = vld [vmem:[%s1434_s10 + $0xc] sm:$0x3]  ;;  %225 = vst [vmem:[#allocation1] ss:$4 sm:$0xff] %v204_v16  ;;  %vm1461_vm7 = vmor %vm1450_vm6, %vm342_vm4 }
  0x21   : > { %287 = vmatpush.bf16.msra.mxu0 %v1122_v8  ;;  %228 = vst [vmem:[#allocation1 + $0x1] ss:$4 sm:$0xff] %v205_v17  ;;  %v301_v22 = vld [vmem:[%s1434_s10] sm:$0x7]  ;;  %v302_v23 = vld [vmem:[%s1434_s10 + $0x4] sm:$0x7]  ;;  %vm1471_vm8 = vmor %vm1461_vm7, %vm344_vm5 }
  0x22   : > { %478 = vmatpush.bf16.msra.mxu1 %v1130_v9  ;;  %231 = vst [vmem:[#allocation1 + $0x2] ss:$4 sm:$0xff] %v206_v18  ;;  %v303_v24 = vld [vmem:[%s1434_s10 + $0x8] sm:$0x7]  ;;  %v304_v25 = vld [vmem:[%s1434_s10 + $0xc] sm:$0x7] }
  0x23   : > { %583 = vmatpush.bf16.msra.mxu2 %v1138_v10  ;;  %234 = vst [vmem:[#allocation1 + $0x3] ss:$4 sm:$0xff] %v207_v19  ;;  %v309_v26 = vrot.slane %v301_v22, 2  ;;  %v310_v27 = vrot.slane %v302_v23, 2  ;;  %v311_v28 = vrot.slane %v303_v24, 2  ;;  %v312_v29 = vrot.slane %v304_v25, 2 }
  0x24   : > { %769 = vmatpush.bf16.msra.mxu3 %v1146_v11  ;;  %v1144_v31 = vld [vmem:[#allocation3 + $0xd8] sm:$0xff]  ;;  %v1127_v38 = vld [vmem:[#allocation3 + $0x50] sm:$0xff]  ;;  %v1118_v53 = vld [vmem:[#allocation3 + $0x8] sm:$0xff]  ;;  %s875_s8 = sshll.u32 %s872_s6, 4  ;;  %s859_s15 = scalar_lea.sflag [#allocation5], %s192_s19  ;;  %s876_s8 = int_to_ptr.hbm [resolvable:$true] %s875_s8 }
  0x25   : > { %288 = vmatpush.bf16.msra.mxu0 %v1121_v12  ;;  %v316_v33 = vsel %vm313_vm1, %v301_v22, %v309_v26  ;;  %v318_v34 = vsel %vm317_vm3, %v301_v22, %v309_v26  ;;  %v323_v35 = vsel %vm313_vm1, %v302_v23, %v310_v27  ;;  %v324_v36 = vsel %vm317_vm3, %v302_v23, %v310_v27  ;;  %v1135_v39 = vld [vmem:[#allocation3 + $0x90] sm:$0xff]  ;;  %v1126_v59 = vld [vmem:[#allocation3 + $0x48] sm:$0xff]  ;;  %v1076_v63 = vld [vmem:[%s1434_s10 + $0x4] sm:$0x7]  ;;  %s1275_s9 = sshra.s32 %s876_s8, 4  ;;  %s1281_s21 = scalar_lea.hbm %s1557_s3, 32  ;;  %s1276_s9 = int_to_ptr.hbm [resolvable:$true] %s1275_s9 }
  0x26   : > { %479 = vmatpush.bf16.msra.mxu1 %v1129_v13  ;;  %v1143_v40 = vld [vmem:[#allocation3 + $0xd0] sm:$0xff]  ;;  %v320_v41 = vrot.slane %v318_v34, 2  ;;  %v326_v42 = vrot.slane %v324_v36, 2  ;;  %v329_v43 = vsel %vm313_vm1, %v303_v24, %v311_v28  ;;  %v330_v44 = vsel %vm317_vm3, %v303_v24, %v311_v28  ;;  %v1134_v60 = vld [vmem:[#allocation3 + $0x88] sm:$0xff]  ;;  %v1077_v4 = vld [vmem:[%s1434_s10 + $0x8] sm:$0x7]  ;;  %p1282_p5 = scmp.lt.s32.totalorder %s1276_s9, %s1557_s3 }
  0x27   : > { %584 = vmatpush.bf16.msra.mxu2 %v1137_v14  ;;  %v332_v45 = vrot.slane %v330_v44, 2  ;;  %v335_v46 = vsel %vm313_vm1, %v304_v25, %v312_v29  ;;  %v336_v47 = vsel %vm317_vm3, %v304_v25, %v312_v29  ;;  %v346_v48 = vshrl.u32 %v316_v33, 16  ;;  %v1142_v5 = vld [vmem:[#allocation3 + $0xc8] sm:$0xff]  ;;  %v1078_v10 = vld [vmem:[%s1434_s10 + $0xc] sm:$0x7] }
  0x28   : > { %770 = vmatpush.bf16.msra.mxu3 %v1145_v15  ;;  %v338_v49 = vrot.slane %v336_v47, 2  ;;  %v349_v50 = vshll.u32 %v316_v33, 16  ;;  %v355_v51 = vshll.u32 %v320_v41, 16  ;;  %v359_v52 = vshrl.u32 %v323_v35, 16  ;;  %v1117_v17 = vld [vmem:[#allocation3] sm:$0xff] }
  0x29   : > { %289 = vmatpush.bf16.msra.mxu0 %v1120_v20  ;;  %v348_v55 = vrot.slane %v346_v48, 6  ;;  %v362_v56 = vshll.u32 %v323_v35, 16  ;;  %v368_v57 = vshll.u32 %v326_v42, 16  ;;  %v372_v58 = vshrl.u32 %v329_v43, 16  ;;  %v1125_v22 = vld [vmem:[#allocation3 + $0x40] sm:$0xff] }
  0x2a   : > { %480 = vmatpush.bf16.msra.mxu1 %v1128_v21  ;;  %v351_v61 = vrot.slane %v349_v50, 7  ;;  %v361_v62 = vrot.slane %v359_v52, 6  ;;  %v357_v0 = vrot.slane %v355_v51, 7  ;;  %v375_v3 = vshll.u32 %v329_v43, 16  ;;  %v1079_v26 = vld [vmem:[%s1434_s10 + $0x10] sm:$0x7] }
  0x2b   : > { %585 = vmatpush.bf16.msra.mxu2 %v1136_v30  ;;  %v364_v1 = vrot.slane %v362_v56, 7  ;;  %v374_v2 = vrot.slane %v372_v58, 6  ;;  %v381_v7 = vshll.u32 %v332_v45, 16  ;;  %v385_v8 = vshrl.u32 %v335_v46, 16  ;;  %v1133_v28 = vld [vmem:[#allocation3 + $0x80] sm:$0xff] }
  0x2c   : > { %771 = vmatpush.bf16.msra.mxu3 %v1144_v31  ;;  %v352_v6 = vor.u32 %v351_v61, %v348_v55  ;;  %v388_v9 = vshll.u32 %v335_v46, 16  ;;  %v235_v11 = vld.sshfl [vmem:[#allocation1] sm:$0xff pattern:$0x73625140]  ;;  %v370_v14 = vrot.slane %v368_v57, 7  ;;  %v377_v15 = vrot.slane %v375_v3, 7 }
  0x2d   : > { %290 = vmatpush.bf16.msra.mxu0 %v1119_v32  ;;  %v365_v13 = vor.u32 %v364_v1, %v361_v62  ;;  %v394_v16 = vshll.u32 %v338_v49, 16  ;;  %v387_v19 = vrot.slane %v385_v8, 6  ;;  %v609_v21 = vrot.slane %v1076_v63, 2  ;;  %v1141_v35 = vld [vmem:[#allocation3 + $0xc0] sm:$0xff]  ;;  %v1040_v54 = vld [vmem:[%s1434_s10 + $0x4] sm:$0x3] }
  0x2e   : > { %481 = vmatpush.bf16.msra.mxu1 %v1127_v38  ;;  %v353_v18 = vrot.slane %v352_v6, 2  ;;  %v390_v20 = vrot.slane %v388_v9, 7  ;;  %v378_v24 = vor.u32 %v377_v15, %v374_v2  ;;  %v383_v25 = vrot.slane %v381_v7, 7  ;;  %v1043_v8 = vld [vmem:[%s1434_s10 + $0x10] sm:$0x3] }
  0x2f   : > { %586 = vmatpush.bf16.msra.mxu2 %v1135_v39  ;;  %v366_v23 = vrot.slane %v365_v13, 2  ;;  %v610_v27 = vrot.slane %v1077_v4, 2  ;;  %v396_v31 = vrot.slane %v394_v16, 7  ;;  %v611_v32 = vrot.slane %v1078_v10, 2 }
  0x30   : > { %772 = vmatpush.bf16.msra.mxu3 %v1143_v40  ;;  %v358_v29 = vsel %vm1471_vm8, %v353_v18, %v357_v0  ;;  %v391_v30 = vor.u32 %v390_v20, %v387_v19  ;;  %v379_v34 = vrot.slane %v378_v24, 2  ;;  %v612_v37 = vrot.slane %v1079_v26, 2  ;;  %v1042_v0 = vld [vmem:[%s1434_s10 + $0xc] sm:$0x3] }
  0x31   : > { %291 = vmatpush.bf16.msra.mxu0 %v1118_v53  ;;  %v371_v33 = vsel %vm1471_vm8, %v366_v23, %v370_v14  ;;  %416 = vst [vmem:[#allocation1] ss:$4 sm:$0xff] %v358_v29  ;;  %v615_v38 = vsel %vm313_vm1, %v1076_v63, %v609_v21  ;;  %v621_v40 = vsel %vm313_vm1, %v1077_v4, %v610_v27 }
  0x32   : > { %482 = vmatpush.bf16.msra.mxu1 %v1126_v59  ;;  %v392_v36 = vrot.slane %v391_v30, 2  ;;  %419 = vst [vmem:[#allocation1 + $0x1] ss:$4 sm:$0xff] %v371_v33  ;;  %v384_v39 = vsel %vm1471_vm8, %v379_v34, %v383_v25  ;;  %v627_v42 = vsel %vm313_vm1, %v1078_v10, %v611_v32  ;;  %v616_v43 = vsel %vm317_vm3, %v1076_v63, %v609_v21  ;;  %v1041_v59 = vld [vmem:[%s1434_s10 + $0x8] sm:$0x3]  ;;  %s1277_s10 = scalar_lea.hbm %s1276_s9, 16 }
  0x33   : > { %587 = vmatpush.bf16.msra.mxu2 %v1134_v60  ;;  %422 = vst [vmem:[#allocation1 + $0x2] ss:$4 sm:$0xff] %v384_v39  ;;  %v637_v44 = vshrl.u32 %v615_v38, 16  ;;  %v640_v45 = vshll.u32 %v615_v38, 16  ;;  %v633_v46 = vsel %vm313_vm1, %v1079_v26, %v612_v37  ;;  %v650_v47 = vshrl.u32 %v621_v40, 16  ;;  %p1278_p1 = scmp.ne.s32.totalorder %s1276_s9, %s1277_s10  ;;  %p1283_p6 = scmp.lt.s32.totalorder %s1281_s21, %s1277_s10 }
  0x34   : > { %773 = vmatpush.bf16.msra.mxu3 %v1142_v5  ;;  %v397_v41 = vsel %vm1471_vm8, %v392_v36, %v396_v31  ;;  %v653_v48 = vshll.u32 %v621_v40, 16  ;;  %v622_v49 = vsel %vm317_vm3, %v1077_v4, %v610_v27  ;;  %v663_v50 = vshrl.u32 %v627_v42, 16 }
  0x35   : > { %292 = vmatpush.bf16.msra.mxu0 %v1117_v17  ;;  %425 = vst [vmem:[#allocation1 + $0x3] ss:$4 sm:$0xff] %v397_v41  ;;  %v666_v51 = vshll.u32 %v627_v42, 16  ;;  %v618_v52 = vrot.slane %v616_v43, 2  ;;  %v628_v53 = vsel %vm317_vm3, %v1078_v10, %v611_v32  ;;  %v634_v55 = vsel %vm317_vm3, %v1079_v26, %v612_v37  ;;  %v1222_v37 = vld [vmem:[%s1556_s2] ss:$0 sm:$0xff]  ;;  %p1279_p2 = pnand %p1278_p1, %p1411_p4  ;;  %p1284_p7 = por %p1283_p6, %p1282_p5 }
  0x36   : > { %483 = vmatpush.bf16.msra.mxu1 %v1125_v22  ;;  %v639_v56 = vrot.slane %v637_v44, 6  ;;  %v642_v57 = vrot.slane %v640_v45, 7  ;;  %v676_v58 = vshrl.u32 %v633_v46, 16  ;;  %v624_v60 = vrot.slane %v622_v49, 2 }
  0x37   : > { %588 = vmatpush.bf16.msra.mxu2 %v1133_v28  ;;  %v652_v61 = vrot.slane %v650_v47, 6  ;;  %v655_v62 = vrot.slane %v653_v48, 7  ;;  %v679_v63 = vshll.u32 %v633_v46, 16  ;;  %v630_v1 = vrot.slane %v628_v53, 2  ;;  %p1280_p3 = pneg %p1279_p2 }
  0x38   : > { %774 = vmatpush.bf16.msra.mxu3 %v1141_v35  ;;  %293 = vmatmul.bf16.vlgmr.msra.gmra.mxu0 %v235_v11  ;;  %v665_v2 = vrot.slane %v663_v50, 6  ;;  %v668_v3 = vrot.slane %v666_v51, 7  ;;  %v636_v5 = vrot.slane %v634_v55, 2  ;;  %v678_v6 = vrot.slane %v676_v58, 6 }
  0x39   : > { %v681_v7 = vrot.slane %v679_v63, 7  ;;  %v643_v9 = vor.u32 %v642_v57, %v639_v56  ;;  %v646_v10 = vshll.u32 %v618_v52, 16  ;;  %v656_v11 = vor.u32 %v655_v62, %v652_v61  ;;  %p1285_p9 = pnand %p1284_p7, %p1280_p3 }
  0x3a   : > { %v659_v13 = vshll.u32 %v624_v60, 16  ;;  %v669_v14 = vor.u32 %v668_v3, %v665_v2  ;;  %v672_v15 = vshll.u32 %v630_v1, 16  ;;  %v685_v17 = vshll.u32 %v636_v5, 16 }
  0x3b   : > { %v682_v16 = vor.u32 %v681_v7, %v678_v6  ;;  %v644_v18 = vrot.slane %v643_v9, 2  ;;  %v648_v19 = vrot.slane %v646_v10, 7  ;;  %v657_v20 = vrot.slane %v656_v11, 2 }
  0x3c   : > { %v426_v4 = vld.sshfl [vmem:[#allocation1] sm:$0xff pattern:$0x73625140]  ;;  %v661_v21 = vrot.slane %v659_v13, 7  ;;  %v670_v22 = vrot.slane %v669_v14, 2  ;;  %v674_v23 = vrot.slane %v672_v15, 7 }
  0x3d   : > { %484 = vmatmul.bf16.vlgmr.msra.gmra.mxu1 %v426_v4  ;;  %521 = vst [vmem:[#allocation1] ss:$4 sm:$0xff] %v1040_v54  ;;  %v683_v24 = vrot.slane %v682_v16, 2  ;;  %v687_v25 = vrot.slane %v685_v17, 7  ;;  %v649_v26 = vsel %vm1471_vm8, %v644_v18, %v648_v19  ;;  %v1348_v48 = vmov 128.0  }
  0x3e   : > { %524 = vst [vmem:[#allocation1 + $0x1] ss:$4 sm:$0xff] %v1041_v59  ;;  %v662_v27 = vsel %vm1471_vm8, %v657_v20, %v661_v21  ;;  %v675_v29 = vsel %vm1471_vm8, %v670_v22, %v674_v23  ;;  %1225 = vrcp.f32 %v1348_v48  ;;  %v1223_v14 = vld [vmem:[%s1556_s2 + $0x1] ss:$0 sm:$0xff]  ;;  %v1224_v17 = vld [vmem:[%s1556_s2 + $0x2] ss:$0 sm:$0xff] }
  0x3f   : > { %527 = vst [vmem:[#allocation1 + $0x2] ss:$4 sm:$0xff] %v1042_v0  ;;  %v688_v30 = vsel %vm1471_vm8, %v683_v24, %v687_v25 }
  0x40   : > { %530 = vst [vmem:[#allocation1 + $0x3] ss:$4 sm:$0xff] %v1043_v8 }
  0x44   : > { %v1226_v49 = vpop.eup %1225 }
  0x45   : > { %v798_v50 = vmul.f32 128.0, %v1226_v49  ;;  %vm802_vm9 = vweird.f32 %v1226_v49 }
  0x47   : > { %v531_v28 = vld.sshfl [vmem:[#allocation1] sm:$0xff pattern:$0x73625140]  ;;  %v799_v51 = vsub.f32 1.0, %v798_v50 }
  0x48   : > { %589 = vmatmul.bf16.vlgmr.msra.gmra.mxu2 %v531_v28  ;;  %707 = vst [vmem:[#allocation1] ss:$4 sm:$0xff] %v649_v26 }
  0x49   : > { %710 = vst [vmem:[#allocation1 + $0x1] ss:$4 sm:$0xff] %v662_v27  ;;  %v800_v52 = vmul.f32 %v1226_v49, %v799_v51 }
  0x4a   : > { %713 = vst [vmem:[#allocation1 + $0x2] ss:$4 sm:$0xff] %v675_v29 }
  0x4b   : > { %716 = vst [vmem:[#allocation1 + $0x3] ss:$4 sm:$0xff] %v688_v30  ;;  %v801_v53 = vadd.f32 %v1226_v49, %v800_v52 }
  0x4d   : > { %v803_v54 = vsel %vm802_vm9, %v1226_v49, %v801_v53 }
  0x52   : > { %v717_v31 = vld.sshfl [vmem:[#allocation1] sm:$0xff pattern:$0x73625140] }
  0x53   : > { %775 = vmatmul.bf16.vlgmr.msra.gmra.mxu3 %v717_v31 }
  0xb5   : > { %v294_v32 = vpop.f32.mrf.mxu0 }
  0xba   : > { %v485_v33 = vpop.f32.mrf.mxu1 }
  0xbb   : > { %v492_v34 = vadd.f32 %v485_v33, %v294_v32 }
  0xbd   : > { %v296_v40 = vpop.f32.mrf.mxu0 }
  0xc2   : > { %v487_v12 = vpop.f32.mrf.mxu1 }
  0xc3   : > { %v493_v43 = vadd.f32 %v487_v12, %v296_v40 }
  0xcb   : > { %v590_v35 = vpop.f32.mrf.mxu2 }
  0xcc   : > { %v597_v36 = vadd.f32 %v590_v35, %v492_v34 }
  0xd3   : > { %v592_v42 = vpop.f32.mrf.mxu2 }
  0xd4   : > { %v598_v44 = vadd.f32 %v592_v42, %v493_v43 }
  0xd6   : > { %v776_v38 = vpop.f32.mrf.mxu3 }
  0xd7   : > { %v783_v39 = vadd.f32 %v776_v38, %v597_v36 }
  0xd9   : > { %v791_v41 = vadd.f32 %v1222_v37, %v783_v39 }
  0xdb   : > { %793 = vadd.xlane.f32.xlu0 %v791_v41 }
  0xde   : > { %v778_v45 = vpop.f32.mrf.mxu3 }
  0xdf   : > { %v784_v46 = vadd.f32 %v778_v45, %v598_v44 }
  0xe1   : > { %v792_v47 = vadd.f32 %v1222_v37, %v784_v46 }
  0xe3   : > { %795 = vadd.xlane.f32.xlu0 %v792_v47 }
 0x14e   : > { %v794_v55 = vpop.xlane.xlu0 %793 }
 0x14f   : > { %v804_v56 = vmul.f32 %v803_v54, %v794_v55 }
 0x151   : > { %v806_v57 = vsub.f32 %v791_v41, %v804_v56 }
 0x153   : > { %v808_v58 = vmul.f32 %v806_v57, %v806_v57 }
 0x155   : > { %810 = vadd.xlane.f32.xlu1 %v808_v58 }
 0x156   : > { %v796_v59 = vpop.xlane.xlu0 %795 }
 0x157   : > { %v805_v60 = vmul.f32 %v803_v54, %v796_v59 }
 0x159   : > { %v807_v61 = vsub.f32 %v792_v47, %v805_v60 }
 0x15b   : > { %v809_v62 = vmul.f32 %v807_v61, %v807_v61 }
 0x15d   : > { %812 = vadd.xlane.f32.xlu1 %v809_v62 }
 0x1c8   : > { %v811_v63 = vpop.xlane.xlu1 %810 }
 0x1c9   : > { %v814_v0 = vmul.f32 %v811_v63, %v803_v54 }
 0x1cb   : > { %v816_v1 = vadd.f32 1e-05, %v814_v0 }
 0x1cd   : > { %1227 = vrsqrt.f32 %v816_v1  ;;  %vm824_vm11 = vweird.f32 %v816_v1 }
 0x1d0   : > { %v813_v2 = vpop.xlane.xlu1 %812 }
 0x1d1   : > { %v815_v3 = vmul.f32 %v813_v2, %v803_v54 }
 0x1d3   : > { %v1228_v4 = vpop.eup %1227  ;;  %v817_v5 = vadd.f32 1e-05, %v815_v3 }
 0x1d4   : > { %v819_v6 = vmul.f32 %v1228_v4, %v816_v1  ;;  %vm825_vm10 = vweird.f32 %v1228_v4 }
 0x1d5   : > { %1229 = vrsqrt.f32 %v817_v5  ;;  %vm826_vm12 = vmor %vm824_vm11, %vm825_vm10  ;;  %vm834_vm14 = vweird.f32 %v817_v5 }
 0x1d6   : > { %v820_v7 = vmul.f32 %v1228_v4, %v819_v6 }
 0x1d8   : > { %v821_v8 = vmul.f32 0.5, %v820_v7 }
 0x1da   : > { %v822_v9 = vsub.f32 1.5, %v821_v8 }
 0x1db   : > { %v1230_v10 = vpop.eup %1229 }
 0x1dc   : > { %v823_v11 = vmul.f32 %v1228_v4, %v822_v9  ;;  %v829_v13 = vmul.f32 %v1230_v10, %v817_v5  ;;  %vm835_vm13 = vweird.f32 %v1230_v10 }
 0x1dd   : > { %vm836_vm15 = vmor %vm834_vm14, %vm835_vm13 }
 0x1de   : > { %v827_v15 = vsel %vm826_vm12, %v1228_v4, %v823_v11  ;;  %v830_v16 = vmul.f32 %v1230_v10, %v829_v13 }
 0x1df   : > { %v838_v18 = vmul.f32 %v827_v15, %v806_v57 }
 0x1e0   : > { %v831_v19 = vmul.f32 0.5, %v830_v16 }
 0x1e1   : > { %v842_v20 = vmul.f32 %v1223_v14, %v838_v18 }
 0x1e2   : > { %v832_v21 = vsub.f32 1.5, %v831_v19 }
 0x1e3   : > { %v846_v22 = vadd.f32 %v1224_v17, %v842_v20 }
 0x1e4   : > { %v833_v23 = vmul.f32 %v1230_v10, %v832_v21 }
 0x1e5   : > { %v850_v24 = vrot.slane %v846_v22, 4  ;;  %854 = vst [vmem:[%s194_s30] sm:$0xf] %v846_v22 }
 0x1e6   : > { %v837_v25 = vsel %vm836_vm15, %v1230_v10, %v833_v23 }
 0x1e7   : > { %855 = vst [vmem:[%s194_s30 + $0x4] sm:$0xf] %v850_v24  ;;  %v839_v26 = vmul.f32 %v837_v25, %v807_v61 }
 0x1e9   : > { %v843_v27 = vmul.f32 %v1223_v14, %v839_v26 }
 0x1eb   : > { %v847_v28 = vadd.f32 %v1224_v17, %v843_v27 }
 0x1ed   : > { %v851_v29 = vrot.slane %v847_v28, 4  ;;  %856 = vst [vmem:[%s194_s30 + $0x8] sm:$0xf] %v847_v28 }
 0x1ef   : > { %857 = vst [vmem:[%s194_s30 + $0xc] sm:$0xf] %v851_v29 }
 0x1f0   : > { %1288 = shalt.err (!%p1285_p9)
}
 0x1f1   : > { %s1349_s19 = smov 64   ;;  %s1350_s27 = smov 4  }
 0x1f2   : > { %1155 = dma.vmem_to_hbm [thread:$0]  (%p1411_p4), %s874_s7, 256, %s876_s8, %s859_s15, %s1349_s19, %s1349_s19, %s1350_s27  }
 0x1f3 PF: > { %p1167_p10 = scmp.ge.s32.totalorder %s1343_s17, 2  ;;  %s890_s28 = sand.u32 1, %s1323_s12  }
 0x1f4   : > { %s891_s29 = scalar_lea.sflag [#allocation5], %s890_s28 }
 0x1f5   : > { %p1162_p11 = pnand %p1167_p10, %p1418_p8 }
 0x1f7   : > { %p1163_p12 = pneg %p1162_p11 }
 0x1f9   : > { %1318 = dma.done.wait (%p1163_p12), %s891_s29, 256  }
 0x1fa   : > { %1320 = vsyncadd (%p1163_p12), %s891_s29, 4294967040  ;;  %s17_s17 = sadd.s32 1, %s1343_s17   ;;  %s1566_s12 = smov %s1327_s13 }
 0x1fb   : > { %p14_p13 = scmp.ge.s32.totalorder %s17_s17, 4   ;;  %s1567_s13 = smov %s1331_s14 }
 0x1fc   : > { %s1568_s14 = smov %s1424_s25  ;;  %s1569_s15 = smov %s1339_s16 }
 0x1fd   : > { %s1570_s16 = smov %s1572_s20  ;;  %16 = sbr.rel (!%p14_p13) target bundleno = 5 (0x5), region = 89 }
 0x202   :  { %897 = vsyncpa [#allocation4], 1 }
 0x203   :  { %899 = vsyncpa [#allocation4 + $0x1], 1 }
 0x204   :  { %900 = vsyncpa [#allocation5], 1 }
 0x205   :  { %902 = vsyncpa [#allocation5 + $0x1], 1 }

</bundles_post_ra>
